<compile_context>
chip_gen: v7x
topology: tpu7x:2x2x1
jax: 0.10.0
libtpu: 0.0.40
codegen_flags: <defaults>
</compile_context>

<pallas_src>
import functools

import jax
import jax.numpy as jnp
from jax.experimental import pallas as pl
from jax.experimental.pallas import tpu as pltpu


def _bce_fbeta_kernel(x_ref, l_ref, bce_out_ref, fs_out_ref,
                      bce_acc, npos_acc, nph_acc, tp_acc, *,
                      beta, eps, batch, feat, tile_b, tile_n,
                      mask_rows, mask_cols):
    ib = pl.program_id(0)           # batch tile
    jn = pl.program_id(1)           # feature chunk (reduction axis, innermost)
    n_chunks = pl.num_programs(1)

    x = x_ref[...].astype(jnp.float32)
    l = l_ref[...].astype(jnp.float32)

    # Neutralise garbage rows/cols of ragged edge blocks BEFORE the
    # transcendentals.  Sentinels: x = -30 (sigmoid/logterm underflow to 0 in
    # f32), l = 0, so padded entries contribute exactly zero to every sum.
    if mask_rows or mask_cols:
        valid = None
        if mask_rows:
            rows = ib * tile_b + jax.lax.broadcasted_iota(jnp.int32, (tile_b, 1), 0)
            valid = rows < batch
        if mask_cols:
            cols = jn * tile_n + jax.lax.broadcasted_iota(jnp.int32, (1, tile_n), 1)
            cvalid = cols < feat
            valid = cvalid if valid is None else jnp.logical_and(valid, cvalid)
        x = jnp.where(valid, x, -30.0)
        l = jnp.where(valid, l, 0.0)

    # Shared EUP work: one tanh + one log per element, no reciprocal.
    s = 0.5 * (1.0 + jnp.tanh(jnp.abs(x) * 0.5))     # sigmoid(|x|)
    p = jnp.where(x >= 0, s, 1.0 - s)                # sigmoid(x)
    # Stable BCE-with-logits: max(x,0) - x*l + log1p(exp(-|x|)); log1p term = -log(s).
    bce_elem = jnp.maximum(x, 0.0) - x * l - jnp.log(s)

    @pl.when(jn == 0)
    def _init():
        bce_acc[...] = jnp.zeros_like(bce_acc)
        npos_acc[...] = jnp.zeros_like(npos_acc)
        nph_acc[...] = jnp.zeros_like(nph_acc)
        tp_acc[...] = jnp.zeros_like(tp_acc)

    # Per-row (lane) reductions, accumulated across feature chunks.
    bce_acc[...] += jnp.sum(bce_elem, axis=1, keepdims=True)
    npos_acc[...] += jnp.sum(p, axis=1, keepdims=True)
    nph_acc[...] += jnp.sum(l, axis=1, keepdims=True)
    tp_acc[...] += jnp.sum(l * p, axis=1, keepdims=True)

    @pl.when(jn == n_chunks - 1)
    def _finalize():
        num_pos = npos_acc[...] + eps
        num_pos_hat = nph_acc[...] + eps
        tp = tp_acc[...]
        precise = tp / num_pos
        recall = tp / num_pos_hat
        b2 = beta * beta
        fs = (1.0 + b2) * precise * recall / (b2 * precise + recall + eps)
        # Padded rows have tp == 0 -> fs == 0, so no extra masking is needed.
        fs_sum = jnp.sum(fs)
        bce_sum = jnp.sum(bce_acc[...])
        # Lane/sublane-dense (1,8,128) partial blocks; final tiny reduce and the
        # bce_weight combine happen in the wrapper.
        bce_out_ref[...] = jnp.broadcast_to(bce_sum, (1, 8, 128))
        fs_out_ref[...] = jnp.broadcast_to(fs_sum, (1, 8, 128))


def _vmem_capacity_bytes():
    try:
        cap = getattr(pltpu.get_tpu_info(), "vmem_capacity_bytes", None)
        if cap:
            return int(cap)
    except Exception:
        pass
    return 64 << 20   # conservative fallback = v7x physical VMEM


def _plan_tiles(B, N, in_itemsize, vmem_cap):
    """Pick (tile_b, tile_n) from the *f32 working set*, not the input itemsize."""
    # Per element: 2 inputs x 2 pipeline buffers (native dtype) + ~8 live f32
    # temporaries (x, l, s, p, bce_elem, products, ...), conservatively counted.
    elem_bytes = 2 * in_itemsize + 8 * 4
    budget = min(max(vmem_cap - (24 << 20), 16 << 20), 64 << 20)

    min_rows = B if B < 8 else 8
    # Chunk the feature axis only if even a minimal-row block over full N
    # overflows the budget (keeps pipelining granularity for wide-N shapes).
    if elem_bytes * min_rows * N > budget and N > 128:
        tile_n = max(128, (budget // (elem_bytes * min_rows)) // 128 * 128)
        tile_n = min(tile_n, N)
    else:
        tile_n = N

    if B < 16:
        tile_b = B                                  # single (full-dim) batch tile
    else:
        rows_fit = max(8, (budget // (elem_bytes * tile_n)) // 8 * 8)
        # Aim for >= 4 batch tiles (v7x megacore sharding + pipelining).
        quarter = max(8, ((-(-B // 4)) + 7) // 8 * 8)
        tile_b = max(8, min(rows_fit, quarter, (B // 8) * 8))
    return tile_b, tile_n


def bce_and_fbeta(logits, labels, *, bce_weight=0.5, beta=2.0, eps=1e-6):
    """Pallas TPU implementation of BCEAndFbeta.forward. Returns a scalar."""
    assert logits.shape == labels.shape and logits.ndim == 2
    B, N = logits.shape
    isx = jnp.dtype(logits.dtype).itemsize
    isl = jnp.dtype(labels.dtype).itemsize
    vmem_cap = _vmem_capacity_bytes()
    tile_b, tile_n = _plan_tiles(B, N, isx + isl, vmem_cap)
    nb = pl.cdiv(B, tile_b)
    nn = pl.cdiv(N, tile_n)
    mask_rows = nb * tile_b != B
    mask_cols = nn * tile_n != N

    kernel = functools.partial(
        _bce_fbeta_kernel,
        beta=float(beta), eps=float(eps), batch=B, feat=N,
        tile_b=tile_b, tile_n=tile_n,
        mask_rows=mask_rows, mask_cols=mask_cols)

    # VMEM limit sized from the actual block footprint (double-buffered inputs +
    # f32 temps), clamped below the queried physical capacity minus headroom.
    block_bytes = tile_b * tile_n * (2 * (isx + isl) + 8 * 4)
    vmem_limit = int(min(max(block_bytes + block_bytes // 4 + (2 << 20), 32 << 20),
                         max(vmem_cap - (8 << 20), 32 << 20)))

    bce_parts, fs_parts = pl.pallas_call(
        kernel,
        out_shape=(jax.ShapeDtypeStruct((nb, 8, 128), jnp.float32),
                   jax.ShapeDtypeStruct((nb, 8, 128), jnp.float32)),
        grid=(nb, nn),
        in_specs=[pl.BlockSpec((tile_b, tile_n), lambda i, j: (i, j)),
                  pl.BlockSpec((tile_b, tile_n), lambda i, j: (i, j))],
        out_specs=(pl.BlockSpec((1, 8, 128), lambda i, j: (i, 0, 0)),
                   pl.BlockSpec((1, 8, 128), lambda i, j: (i, 0, 0))),
        scratch_shapes=[pltpu.VMEM((tile_b, 1), jnp.float32)] * 4,
        compiler_params=pltpu.CompilerParams(
            dimension_semantics=("parallel", "arbitrary"),
            vmem_limit_bytes=vmem_limit),
    )(logits, labels)

    # Final tiny reduction + combine in the wrapper (use FULL B and B*N).
    bce_mean = jnp.sum(bce_parts[:, 0, 0]) / jnp.float32(B * N)
    f1_loss = 1.0 - jnp.sum(fs_parts[:, 0, 0]) / jnp.float32(B)
    return bce_weight * bce_mean + (1.0 - bce_weight) * f1_loss


def _reference(logits, labels, bce_weight=0.5, beta=2.0, eps=1e-6):
    x = logits.astype(jnp.float32)
    l = labels.astype(jnp.float32)
    bce = jnp.mean(jnp.maximum(x, 0.0) - x * l + jnp.log1p(jnp.exp(-jnp.abs(x))))
    p = jax.nn.sigmoid(x)
    num_pos = jnp.sum(p, axis=1) + eps
    num_pos_hat = jnp.sum(l, axis=1) + eps
    tp = jnp.sum(l * p, axis=1)
    precise = tp / num_pos
    recall = tp / num_pos_hat
    b2 = beta * beta
    fs = (1 + b2) * precise * recall / (b2 * precise + recall + eps)
    f1 = 1.0 - jnp.sum(fs) / x.shape[0]
    return bce_weight * bce + (1 - bce_weight) * f1


if __name__ == "__main__":
    key = jax.random.PRNGKey(0)
    k1, k2 = jax.random.split(key)
    B, N = 20, 256   # B chosen so the last batch tile is ragged (exercises masking)
    logits = jax.random.normal(k1, (B, N), dtype=jnp.float32) * 2.0
    labels = (jax.random.uniform(k2, (B, N)) > 0.5).astype(jnp.float32)

    loss = jax.block_until_ready(bce_and_fbeta(logits, labels))
    ref = _reference(logits, labels)
    assert jnp.allclose(loss, ref, atol=2e-3, rtol=2e-3), (loss, ref)
    print("KERNEL_OK")
</pallas_src>

<mosaic_0001>
module attributes {stable_mosaic.version = 11 : i64} {
  func.func @_bce_fbeta_kernel(%arg0: i32, %arg1: i32, %arg2: memref<8x256xf32, #tpu.memory_space<vmem>>, %arg3: memref<8x256xf32, #tpu.memory_space<vmem>>, %arg4: memref<1x8x128xf32, #tpu.memory_space<vmem>>, %arg5: memref<1x8x128xf32, #tpu.memory_space<vmem>>, %arg6: memref<8x1xf32, #tpu.memory_space<vmem>>, %arg7: memref<8x1xf32, #tpu.memory_space<vmem>>, %arg8: memref<8x1xf32, #tpu.memory_space<vmem>>, %arg9: memref<8x1xf32, #tpu.memory_space<vmem>>) attributes {dimension_semantics = [#tpu.dimension_semantics<parallel>, #tpu.dimension_semantics<arbitrary>], iteration_bounds = array<i64: 3, 1>, scalar_prefetch = 0 : i64, scratch_operands = 4 : i64, tpu.core_type = #tpu.core_type<tc>, window_params = [{transform_indices = @transform_0, window_bounds = array<i64: 8, 256>}, {transform_indices = @transform_1, window_bounds = array<i64: 8, 256>}, {transform_indices = @transform_2, window_bounds = array<i64: 1, 8, 128>}, {transform_indices = @transform_3, window_bounds = array<i64: 1, 8, 128>}]} {
    %c0 = arith.constant 0 : index
    %c0_0 = arith.constant 0 : index
    %0 = vector.load %arg2[%c0, %c0_0] : memref<8x256xf32, #tpu.memory_space<vmem>>, vector<8x256xf32>
    %c0_1 = arith.constant 0 : index
    %c0_2 = arith.constant 0 : index
    %1 = vector.load %arg3[%c0_1, %c0_2] : memref<8x256xf32, #tpu.memory_space<vmem>>, vector<8x256xf32>
    %c8_i32 = arith.constant 8 : i32
    %2 = arith.muli %arg0, %c8_i32 : i32
    %3 = tpu.iota {dimensions = array<i32: 0>} : vector<8x1xi32>
    %4 = vector.broadcast %2 : i32 to vector<8x1xi32>
    %5 = arith.addi %4, %3 : vector<8x1xi32>
    %c20_i32 = arith.constant 20 : i32
    %6 = vector.broadcast %c20_i32 : i32 to vector<8x1xi32>
    %7 = arith.cmpi slt, %5, %6 : vector<8x1xi32>
    %cst = arith.constant -3.000000e+01 : f32
    %8 = vector.shape_cast %7 : vector<8x1xi1> to vector<8x1xi1>
    %9 = vector.broadcast %8 : vector<8x1xi1> to vector<8x256xi1>
    %10 = vector.broadcast %cst : f32 to vector<8x256xf32>
    %11 = arith.select %9, %0, %10 : vector<8x256xi1>, vector<8x256xf32>
    %cst_3 = arith.constant 0.000000e+00 : f32
    %12 = vector.shape_cast %7 : vector<8x1xi1> to vector<8x1xi1>
    %13 = vector.broadcast %12 : vector<8x1xi1> to vector<8x256xi1>
    %14 = vector.broadcast %cst_3 : f32 to vector<8x256xf32>
    %15 = arith.select %13, %1, %14 : vector<8x256xi1>, vector<8x256xf32>
    %16 = math.absf %11 : vector<8x256xf32>
    %cst_4 = arith.constant 5.000000e-01 : f32
    %17 = vector.broadcast %cst_4 : f32 to vector<8x256xf32>
    %18 = arith.mulf %16, %17 : vector<8x256xf32>
    %19 = math.tanh %18 : vector<8x256xf32>
    %cst_5 = arith.constant 1.000000e+00 : f32
    %20 = vector.broadcast %cst_5 : f32 to vector<8x256xf32>
    %21 = arith.addf %20, %19 : vector<8x256xf32>
    %cst_6 = arith.constant 5.000000e-01 : f32
    %22 = vector.broadcast %cst_6 : f32 to vector<8x256xf32>
    %23 = arith.mulf %22, %21 : vector<8x256xf32>
    %cst_7 = arith.constant 0.000000e+00 : f32
    %24 = vector.broadcast %cst_7 : f32 to vector<8x256xf32>
    %25 = arith.cmpf oge, %11, %24 : vector<8x256xf32>
    %cst_8 = arith.constant 1.000000e+00 : f32
    %26 = vector.broadcast %cst_8 : f32 to vector<8x256xf32>
    %27 = arith.subf %26, %23 : vector<8x256xf32>
    %28 = arith.select %25, %23, %27 : vector<8x256xi1>, vector<8x256xf32>
    %cst_9 = arith.constant 0.000000e+00 : f32
    %29 = vector.broadcast %cst_9 : f32 to vector<8x256xf32>
    %30 = arith.maximumf %11, %29 : vector<8x256xf32>
    %31 = arith.mulf %11, %15 : vector<8x256xf32>
    %32 = arith.subf %30, %31 : vector<8x256xf32>
    %33 = math.log %23 : vector<8x256xf32>
    %34 = arith.subf %32, %33 : vector<8x256xf32>
    %c0_i32 = arith.constant 0 : i32
    %35 = arith.cmpi eq, %arg1, %c0_i32 : i32
    %36 = arith.extui %35 : i1 to i32
    %c0_i32_10 = arith.constant 0 : i32
    %37 = arith.cmpi ne, %36, %c0_i32_10 : i32
    scf.if %37 {
      %cst_33 = arith.constant 0.000000e+00 : f32
      %62 = vector.broadcast %cst_33 : f32 to vector<8x1xf32>
      %c0_34 = arith.constant 0 : index
      %c0_35 = arith.constant 0 : index
      %63 = vector.load %arg6[%c0_34, %c0_35] : memref<8x1xf32, #tpu.memory_space<vmem>>, vector<8x1xf32>
      tpu.vector_store %arg6[%c0_34, %c0_35], %62 {strides = array<i32>} : memref<8x1xf32, #tpu.memory_space<vmem>>, vector<8x1xf32>,
      %cst_36 = arith.constant 0.000000e+00 : f32
      %64 = vector.broadcast %cst_36 : f32 to vector<8x1xf32>
      %c0_37 = arith.constant 0 : index
      %c0_38 = arith.constant 0 : index
      %65 = vector.load %arg7[%c0_37, %c0_38] : memref<8x1xf32, #tpu.memory_space<vmem>>, vector<8x1xf32>
      tpu.vector_store %arg7[%c0_37, %c0_38], %64 {strides = array<i32>} : memref<8x1xf32, #tpu.memory_space<vmem>>, vector<8x1xf32>,
      %cst_39 = arith.constant 0.000000e+00 : f32
      %66 = vector.broadcast %cst_39 : f32 to vector<8x1xf32>
      %c0_40 = arith.constant 0 : index
      %c0_41 = arith.constant 0 : index
      %67 = vector.load %arg8[%c0_40, %c0_41] : memref<8x1xf32, #tpu.memory_space<vmem>>, vector<8x1xf32>
      tpu.vector_store %arg8[%c0_40, %c0_41], %66 {strides = array<i32>} : memref<8x1xf32, #tpu.memory_space<vmem>>, vector<8x1xf32>,
      %cst_42 = arith.constant 0.000000e+00 : f32
      %68 = vector.broadcast %cst_42 : f32 to vector<8x1xf32>
      %c0_43 = arith.constant 0 : index
      %c0_44 = arith.constant 0 : index
      %69 = vector.load %arg9[%c0_43, %c0_44] : memref<8x1xf32, #tpu.memory_space<vmem>>, vector<8x1xf32>
      tpu.vector_store %arg9[%c0_43, %c0_44], %68 {strides = array<i32>} : memref<8x1xf32, #tpu.memory_space<vmem>>, vector<8x1xf32>,
    } else {
    }
    %c0_11 = arith.constant 0 : index
    %c0_12 = arith.constant 0 : index
    %38 = vector.load %arg6[%c0_11, %c0_12] : memref<8x1xf32, #tpu.memory_space<vmem>>, vector<8x1xf32>
    %cst_13 = arith.constant dense<0.000000e+00> : vector<8xf32>
    %39 = vector.multi_reduction <add>, %34, %cst_13 [1] : vector<8x256xf32> to vector<8xf32>
    %40 = vector.shape_cast %39 : vector<8xf32> to vector<8x1xf32>
    %41 = arith.addf %38, %40 : vector<8x1xf32>
    %c0_14 = arith.constant 0 : index
    %c0_15 = arith.constant 0 : index
    %42 = vector.load %arg6[%c0_14, %c0_15] : memref<8x1xf32, #tpu.memory_space<vmem>>, vector<8x1xf32>
    tpu.vector_store %arg6[%c0_14, %c0_15], %41 {strides = array<i32>} : memref<8x1xf32, #tpu.memory_space<vmem>>, vector<8x1xf32>,
    %c0_16 = arith.constant 0 : index
    %c0_17 = arith.constant 0 : index
    %43 = vector.load %arg7[%c0_16, %c0_17] : memref<8x1xf32, #tpu.memory_space<vmem>>, vector<8x1xf32>
    %cst_18 = arith.constant dense<0.000000e+00> : vector<8xf32>
    %44 = vector.multi_reduction <add>, %28, %cst_18 [1] : vector<8x256xf32> to vector<8xf32>
    %45 = vector.shape_cast %44 : vector<8xf32> to vector<8x1xf32>
    %46 = arith.addf %43, %45 : vector<8x1xf32>
    %c0_19 = arith.constant 0 : index
    %c0_20 = arith.constant 0 : index
    %47 = vector.load %arg7[%c0_19, %c0_20] : memref<8x1xf32, #tpu.memory_space<vmem>>, vector<8x1xf32>
    tpu.vector_store %arg7[%c0_19, %c0_20], %46 {strides = array<i32>} : memref<8x1xf32, #tpu.memory_space<vmem>>, vector<8x1xf32>,
    %c0_21 = arith.constant 0 : index
    %c0_22 = arith.constant 0 : index
    %48 = vector.load %arg8[%c0_21, %c0_22] : memref<8x1xf32, #tpu.memory_space<vmem>>, vector<8x1xf32>
    %cst_23 = arith.constant dense<0.000000e+00> : vector<8xf32>
    %49 = vector.multi_reduction <add>, %15, %cst_23 [1] : vector<8x256xf32> to vector<8xf32>
    %50 = vector.shape_cast %49 : vector<8xf32> to vector<8x1xf32>
    %51 = arith.addf %48, %50 : vector<8x1xf32>
    %c0_24 = arith.constant 0 : index
    %c0_25 = arith.constant 0 : index
    %52 = vector.load %arg8[%c0_24, %c0_25] : memref<8x1xf32, #tpu.memory_space<vmem>>, vector<8x1xf32>
    tpu.vector_store %arg8[%c0_24, %c0_25], %51 {strides = array<i32>} : memref<8x1xf32, #tpu.memory_space<vmem>>, vector<8x1xf32>,
    %c0_26 = arith.constant 0 : index
    %c0_27 = arith.constant 0 : index
    %53 = vector.load %arg9[%c0_26, %c0_27] : memref<8x1xf32, #tpu.memory_space<vmem>>, vector<8x1xf32>
    %54 = arith.mulf %15, %28 : vector<8x256xf32>
    %cst_28 = arith.constant dense<0.000000e+00> : vector<8xf32>
    %55 = vector.multi_reduction <add>, %54, %cst_28 [1] : vector<8x256xf32> to vector<8xf32>
    %56 = vector.shape_cast %55 : vector<8xf32> to vector<8x1xf32>
    %57 = arith.addf %53, %56 : vector<8x1xf32>
    %c0_29 = arith.constant 0 : index
    %c0_30 = arith.constant 0 : index
    %58 = vector.load %arg9[%c0_29, %c0_30] : memref<8x1xf32, #tpu.memory_space<vmem>>, vector<8x1xf32>
    tpu.vector_store %arg9[%c0_29, %c0_30], %57 {strides = array<i32>} : memref<8x1xf32, #tpu.memory_space<vmem>>, vector<8x1xf32>,
    %c0_i32_31 = arith.constant 0 : i32
    %59 = arith.cmpi eq, %arg1, %c0_i32_31 : i32
    %60 = arith.extui %59 : i1 to i32
    %c0_i32_32 = arith.constant 0 : i32
    %61 = arith.cmpi ne, %60, %c0_i32_32 : i32
    scf.if %61 {
      %c0_33 = arith.constant 0 : index
      %c0_34 = arith.constant 0 : index
      %62 = vector.load %arg7[%c0_33, %c0_34] : memref<8x1xf32, #tpu.memory_space<vmem>>, vector<8x1xf32>
      %cst_35 = arith.constant 9.99999997E-7 : f32
      %63 = vector.broadcast %cst_35 : f32 to vector<8x1xf32>
      %64 = arith.addf %62, %63 : vector<8x1xf32>
      %c0_36 = arith.constant 0 : index
      %c0_37 = arith.constant 0 : index
      %65 = vector.load %arg8[%c0_36, %c0_37] : memref<8x1xf32, #tpu.memory_space<vmem>>, vector<8x1xf32>
      %cst_38 = arith.constant 9.99999997E-7 : f32
      %66 = vector.broadcast %cst_38 : f32 to vector<8x1xf32>
      %67 = arith.addf %65, %66 : vector<8x1xf32>
      %c0_39 = arith.constant 0 : index
      %c0_40 = arith.constant 0 : index
      %68 = vector.load %arg9[%c0_39, %c0_40] : memref<8x1xf32, #tpu.memory_space<vmem>>, vector<8x1xf32>
      %69 = arith.divf %68, %64 : vector<8x1xf32>
      %70 = arith.divf %68, %67 : vector<8x1xf32>
      %cst_41 = arith.constant 5.000000e+00 : f32
      %71 = vector.broadcast %cst_41 : f32 to vector<8x1xf32>
      %72 = arith.mulf %71, %69 : vector<8x1xf32>
      %73 = arith.mulf %72, %70 : vector<8x1xf32>
      %cst_42 = arith.constant 4.000000e+00 : f32
      %74 = vector.broadcast %cst_42 : f32 to vector<8x1xf32>
      %75 = arith.mulf %74, %69 : vector<8x1xf32>
      %76 = arith.addf %75, %70 : vector<8x1xf32>
      %cst_43 = arith.constant 9.99999997E-7 : f32
      %77 = vector.broadcast %cst_43 : f32 to vector<8x1xf32>
      %78 = arith.addf %76, %77 : vector<8x1xf32>
      %79 = arith.divf %73, %78 : vector<8x1xf32>
      %80 = vector.shape_cast %79 : vector<8x1xf32> to vector<1x8x1xf32>
      %cst_44 = arith.constant dense<0.000000e+00> : vector<1xf32>
      %81 = vector.multi_reduction <add>, %80, %cst_44 [1, 2] : vector<1x8x1xf32> to vector<1xf32>
      %82 = vector.shape_cast %81 : vector<1xf32> to vector<1x1x1xf32>
      %83 = vector.extract %82[0, 0, 0] : f32 from vector<1x1x1xf32>
      %c0_45 = arith.constant 0 : index
      %c0_46 = arith.constant 0 : index
      %84 = vector.load %arg6[%c0_45, %c0_46] : memref<8x1xf32, #tpu.memory_space<vmem>>, vector<8x1xf32>
      %85 = vector.shape_cast %84 : vector<8x1xf32> to vector<1x8x1xf32>
      %cst_47 = arith.constant dense<0.000000e+00> : vector<1xf32>
      %86 = vector.multi_reduction <add>, %85, %cst_47 [1, 2] : vector<1x8x1xf32> to vector<1xf32>
      %87 = vector.shape_cast %86 : vector<1xf32> to vector<1x1x1xf32>
      %88 = vector.extract %87[0, 0, 0] : f32 from vector<1x1x1xf32>
      %89 = vector.broadcast %88 : f32 to vector<1x8x128xf32>
      %c0_48 = arith.constant 0 : index
      %c0_49 = arith.constant 0 : index
      %c0_50 = arith.constant 0 : index
      %90 = vector.load %arg4[%c0_48, %c0_49, %c0_50] : memref<1x8x128xf32, #tpu.memory_space<vmem>>, vector<1x8x128xf32>
      tpu.vector_store %arg4[%c0_48, %c0_49, %c0_50], %89 {strides = array<i32>} : memref<1x8x128xf32, #tpu.memory_space<vmem>>, vector<1x8x128xf32>,
      %91 = vector.broadcast %83 : f32 to vector<1x8x128xf32>
      %c0_51 = arith.constant 0 : index
      %c0_52 = arith.constant 0 : index
      %c0_53 = arith.constant 0 : index
      %92 = vector.load %arg5[%c0_51, %c0_52, %c0_53] : memref<1x8x128xf32, #tpu.memory_space<vmem>>, vector<1x8x128xf32>
      tpu.vector_store %arg5[%c0_51, %c0_52, %c0_53], %91 {strides = array<i32>} : memref<1x8x128xf32, #tpu.memory_space<vmem>>, vector<1x8x128xf32>,
    } else {
    }
    return
  }
  func.func @transform_0(%arg0: i32, %arg1: i32) -> (i32, i32) {
    %c0_i32 = arith.constant 0 : i32
    return %arg0, %arg1 : i32, i32
  }
  func.func @transform_1(%arg0: i32, %arg1: i32) -> (i32, i32) {
    %c0_i32 = arith.constant 0 : i32
    return %arg0, %arg1 : i32, i32
  }
  func.func @transform_2(%arg0: i32, %arg1: i32) -> (i32, i32, i32) {
    %c0_i32 = arith.constant 0 : i32
    %c0_i32_0 = arith.constant 0 : i32
    %c0_i32_1 = arith.constant 0 : i32
    return %arg0, %c0_i32, %c0_i32_0 : i32, i32, i32
  }
  func.func @transform_3(%arg0: i32, %arg1: i32) -> (i32, i32, i32) {
    %c0_i32 = arith.constant 0 : i32
    %c0_i32_0 = arith.constant 0 : i32
    %c0_i32_1 = arith.constant 0 : i32
    return %arg0, %c0_i32, %c0_i32_0 : i32, i32, i32
  }
}

</mosaic_0001>

<bundles_post_ra>
// kernel: tpu_custom_call.1
= control target key start
LH: loop header
LB: loop body
LE: loop exit
PB: predicated region body
PF: predicated region fallthrough
CT: control target
= control target key end

     0   :  { %9 = vsyncpa [#allocation7], 0  ;;  %s1140_s0 = inlined_call_operand.hbm [shape: f32[20,256], index: 0, kind: input, shape index: {}]   ;;  %s1141_s1 = inlined_call_operand.hbm [shape: f32[20,256], index: 1, kind: input, shape index: {}]   ;;  %s1142_s2 = inlined_call_operand.hbm [shape: f32[3,8,128], index: 2, kind: output, shape index: {0}]   ;;  %s1143_s3 = inlined_call_operand.hbm [shape: f32[3,8,128], index: 3, kind: output, shape index: {1}]  }
   0x1   :  { %11 = vsyncpa [#allocation7 + $0x1], 0 }
   0x2   :  { %12 = vsyncpa [#allocation10], 0 }
   0x3   :  { %14 = vsyncpa [#allocation10 + $0x1], 0 }
   0x4   :  { %15 = vsyncpa [#allocation8], 0 }
   0x5   :  { %17 = vsyncpa [#allocation8 + $0x1], 0 }
   0x6   :  { %18 = vsyncpa [#allocation13], 0 }
   0x7   :  { %20 = vsyncpa [#allocation13 + $0x1], 0  ;;  %s873_s12 = smov 0   ;;  %s875_s13 = smov 0  }
   0x8   :  { %s877_s14 = smov 0   ;;  %s879_s15 = smov 0  }
   0x9   :  { %s881_s16 = smov 0   ;;  %s883_s17 = smov 0  }
   0xa LB: > { %s553_s18 = sadd.s32 4294967295, %s846_s17   ;;  %s554_s19 = sadd.s32 4294967294, %s846_s17   ;;  %s846_s17 = sphi %s883_s17, %s26_s17   ;;  %s842_s16 = sphi %s881_s16, %s1162_s16   ;;  %s838_s15 = sphi %s879_s15, %s1161_s15   ;;  %s834_s14 = sphi %s877_s14, %s1160_s14   ;;  %s830_s13 = sphi %s875_s13, %s1159_s13   ;;  %s826_s12 = sphi %s873_s12, %s1158_s12  }
   0xb   : > { %s38_s20 = sadd.s32 1, %s842_s16  ;;  %s47_s21 = sadd.s32 1, %s834_s14 }
   0xc   : > { %p40_p0 = scmp.ge.s32.totalorder %s38_s20, 3  ;;  %p54_p1 = scmp.ne.s32.totalorder %s834_s14, %s830_s13 }
   0xd   : > { %p55_p2 = scmp.eq.s32.totalorder %s846_s17, 0  ;;  %p60_p3 = scmp.ne.s32.totalorder %s830_s13, %s826_s12 }
   0xe   : > { %s1164_s20 = smov (%p40_p0, %s38_s20), 0  ;;  %p61_p5 = scmp.eq.s32.totalorder %s553_s18, 0 }
   0xf   : > { %p914_p4 = por %p55_p2, %p54_p1  ;;  %s42_s23 = ssub.s32 %s842_s16, %s1164_s20 }
  0x10   : > { %p112_p6 = scmp.eq.s32.totalorder %s553_s18, 2  ;;  %p45_p7 = scmp.eq.s32.totalorder %s42_s23, 0 }
  0x11   : > { %p920_p8 = por %p61_p5, %p60_p3  ;;  %p118_p10 = scmp.eq.s32.totalorder %s554_s19, 2 }
  0x12   : > { %p924_p9 = por %p112_p6, %p54_p1  ;;  %p603_p12 = scmp.lt.s32.totalorder %s846_s17, 3 }
  0x13   : > { %s1147_s24 = scalar_select %p920_p8, 1, 0 }
  0x14   : > { %s1148_s25 = scalar_select %p924_p9, 1, 0 }
  0x15   : > { %s929_s26 = scalar_select %p45_p7, %s834_s14, %s47_s21  }
  0x16   : > { %p931_p11 = por %p118_p10, %p60_p3  ;;  %s937_s28 = sand.u32 1, %s834_s14  }
  0x17   : > { %s557_s29 = sshll.u32 %s937_s28, 4  ;;  %s575_s30 = sshll.u32 %s842_s16, 8 }
  0x18   : > { %s1149_s27 = scalar_select %p931_p11, 1, 0 }
  0x19   : > { %s946_s6 = scalar_lea.hbm %s1140_s0, %s575_s30  ;;  %s168_s7 = scalar_lea.vmem [#allocation6], %s557_s29 }
  0x1a   : > { %s178_s8 = sshll.u32 %s168_s7, 4  ;;  %p954_p13 = pnand %p603_p12, %p914_p4  ;;  %s950_s8 = int_to_ptr.vmem [resolvable:$true] %s178_s8 }
  0x1b   : > { %s165_s10 = scalar_lea.sflag [#allocation7], %s937_s28  ;;  %s668_s11 = scalar_lea.hbm %s946_s6, 256 }
  0x1c   : > { %p669_p2 = scmp.ne.s32.totalorder %s946_s6, %s668_s11  ;;  %p670_p3 = pneg %p954_p13 }
  0x1d   : > { %s673_s21 = scalar_lea.hbm %s1140_s0, 768  ;;  %p674_p4 = scmp.lt.u32.totalorder %s946_s6, %s1140_s0 }
  0x1e   : > { %p671_p5 = pnand %p670_p3, %p669_p2  ;;  %p675_p7 = scmp.lt.u32.totalorder %s673_s21, %s668_s11 }
  0x1f   : > { %p677_p12 = scmp.lt.u32.totalorder %s668_s11, %s946_s6 }
  0x20   : > { %p672_p6 = pneg %p671_p5  ;;  %p676_p10 = por %p675_p7, %p674_p4 }
  0x22   : > { %p678_p0 = por %p677_p12, %p676_p10 }
  0x24   : > { %p679_p1 = pnand %p678_p0, %p672_p6 }
  0x26   : > { %682 = shalt.err (!%p679_p1)
}
  0x27   : > { %s683_s4 = scalar_lea.vmem %s950_s8, 256  ;;  %s848_s5 = smov [#allocation6]  }
  0x28   : > { %p684_p2 = scmp.ne.s32.totalorder %s950_s8, %s683_s4  ;;  %s688_s7 = sshll.u32 %s848_s5, 4  ;;  %s689_s7 = int_to_ptr.vmem [resolvable:$false] %s688_s7 }
  0x29   : > { %s690_s18 = scalar_lea.vmem %s689_s7, 512  ;;  %p691_p9 = scmp.lt.s32.totalorder %s950_s8, %s689_s7 }
  0x2a   : > { %p686_p5 = pnand %p684_p2, %p670_p3  ;;  %p692_p4 = scmp.lt.s32.totalorder %s690_s18, %s683_s4 }
  0x2c   : > { %p687_p11 = pneg %p686_p5  ;;  %p693_p7 = por %p692_p4, %p691_p9 }
  0x2e   : > { %p694_p10 = pnand %p693_p7, %p687_p11 }
  0x30   : > { %697 = shalt.err (!%p694_p10)
}
  0x31   : > { %592 = dma.hbm_to_vmem [thread:$0]  (!%p954_p13), %s946_s6, 256, %s950_s8, %s165_s10  }
  0x32   : > { %p1151_p0 = scmp.lt.s32.totalorder %s846_s17, 4  ;;  %p1152_p1 = scmp.ge.s32.totalorder %s846_s17, 1 }
  0x33   : > { %s999_s22 = scalar_lea.hbm %s1141_s1, %s575_s30  ;;  %s189_s23 = scalar_lea.vmem [#allocation9], %s557_s29 }
  0x34   : > { %p990_p6 = pnand %p1152_p1, %p1151_p0  ;;  %s199_s4 = sshll.u32 %s189_s23, 4  ;;  %s200_s4 = int_to_ptr.vmem [resolvable:$true] %s199_s4 }
  0x35   : > { %s186_s6 = scalar_lea.sflag [#allocation10], %s937_s28  ;;  %s698_s8 = scalar_lea.hbm %s999_s22, 256 }
  0x36   : > { %s1153_s11 = scalar_select %p990_p6, 1, 0 }
  0x37   : > { %p699_p9 = scmp.ne.s32.totalorder %s999_s22, %s698_s8  ;;  %s703_s30 = scalar_lea.hbm %s1141_s1, 768 }
  0x38   : > { %p704_p2 = scmp.lt.u32.totalorder %s999_s22, %s1141_s1  ;;  %p705_p5 = scmp.lt.u32.totalorder %s703_s30, %s698_s8 }
  0x39   : > { %p701_p11 = pnand %p699_p9, %p670_p3  ;;  %p707_p7 = scmp.lt.u32.totalorder %s698_s8, %s999_s22 }
  0x3a   : > { %p706_p4 = por %p705_p5, %p704_p2 }
  0x3b   : > { %p702_p12 = pneg %p701_p11 }
  0x3c   : > { %p708_p10 = por %p707_p7, %p706_p4 }
  0x3e   : > { %p709_p0 = pnand %p708_p10, %p702_p12 }
  0x40   : > { %712 = shalt.err (!%p709_p0)
}
  0x41   : > { %s713_s28 = scalar_lea.vmem %s200_s4, 256  ;;  %s849_s29 = smov [#allocation9]  }
  0x42   : > { %p714_p1 = scmp.ne.s32.totalorder %s200_s4, %s713_s28  ;;  %s718_s19 = sshll.u32 %s849_s29, 4  ;;  %s719_s19 = int_to_ptr.vmem [resolvable:$false] %s718_s19 }
  0x43   : > { %s720_s21 = scalar_lea.vmem %s719_s19, 512  ;;  %p721_p8 = scmp.lt.s32.totalorder %s200_s4, %s719_s19 }
  0x44   : > { %p716_p9 = pnand %p714_p1, %p670_p3  ;;  %p722_p6 = scmp.lt.s32.totalorder %s720_s21, %s713_s28 }
  0x46   : > { %p717_p11 = pneg %p716_p9  ;;  %p723_p2 = por %p722_p6, %p721_p8 }
  0x48   : > { %p724_p5 = pnand %p723_p2, %p717_p11 }
  0x4a   : > { %727 = shalt.err (!%p724_p5)
}
  0x4b   : > { %595 = dma.hbm_to_vmem [thread:$0]  (!%p954_p13), %s999_s22, 256, %s200_s4, %s186_s6  }
  0x4c   : > { %p1154_p12 = scmp.ne.s32.totalorder %s1153_s11, 0 }
  0x4d   : > { %s1026_s23 = sand.u32 (!%p1154_p12), 1, %s830_s13   ;;  %p1155_p3 = scmp.ne.s32.totalorder (!%p1154_p12), %s1147_s24, 0 }
  0x4e   : > { %208 = sbr.rel (%p1154_p12) target bundleno = 553 (0x229), region = 28  ;;  %s564_s8 = sshll.u32 (!%p1154_p12), %s1026_s23, 4 }
  0x4f   : > { %s211_s10 = scalar_lea.sflag (!%p1154_p12), [#allocation7], %s1026_s23  ;;  %s214_s5 = scalar_lea.vmem (!%p1154_p12), [#allocation6], %s564_s8 }
  0x55   : > { %809 = dma.done.wait (%p1155_p3), %s211_s10, 256  }
  0x56   : > { %811 = vsyncadd (%p1155_p3), %s211_s10, 4294967040  ;;  %s220_s9 = scalar_lea.sflag [#allocation10], %s1026_s23  ;;  %s1035_s22 = scalar_lea.vmem [#allocation9], %s564_s8 }
  0x57   : > { %813 = dma.done.wait (%p1155_p3), %s220_s9, 256  }
  0x58   : > { %815 = vsyncadd (%p1155_p3), %s220_s9, 4294967040  ;;  %s568_s11 = sshll.u32 %s838_s15, 3  ;;  %v263_v0 = vlaneseq  ;;  %vm306_vm0 = vcmask 7168   ;;  %v850_v2 = vmov 0.0   ;;  %v258_v5 = vld [vmem:[%s214_s5] sm:$0xff]  ;;  %v259_v6 = vld [vmem:[%s214_s5 + $0x8] sm:$0xff] }
  0x59   : > { %v265_v1 = vstv %s568_s11  ;;  %308 = vst.msk [vmem:[#allocation3] sm:$0xff] %vm306_vm0, %v850_v2  ;;  %307 = vst.msk [vmem:[#allocation2] sm:$0xff] %vm306_vm0, %v850_v2  ;;  %v260_v19 = vld [vmem:[%s1035_s22] sm:$0xff]  ;;  %v261_v21 = vld [vmem:[%s1035_s22 + $0x8] sm:$0xff]  ;;  %s566_s24 = sshll.u32 %s1026_s23, 3  ;;  %s571_s30 = sshll.u32 %s838_s15, 7 }
  0x5a   : > { %309 = vst.msk [vmem:[#allocation4] sm:$0xff] %vm306_vm0, %v850_v2  ;;  %310 = vst.msk [vmem:[#allocation5] sm:$0xff] %vm306_vm0, %v850_v2  ;;  %v264_v3 = vshrl.u32 %v263_v0, 7  ;;  %s248_s4 = scalar_lea.vmem [#allocation11], %s566_s24  ;;  %s255_s7 = scalar_lea.vmem [#allocation12], %s566_s24 }
  0x5b   : > { %s401_s6 = sshll.u32 %s248_s4, 4  ;;  %s414_s18 = sshll.u32 %s255_s7, 4  ;;  %s1060_s6 = int_to_ptr.vmem [resolvable:$true] %s401_s6  ;;  %s1067_s18 = int_to_ptr.vmem [resolvable:$true] %s414_s18 }
  0x5c   : > { %v266_v4 = vadd.s32 %v265_v1, %v264_v3  ;;  %s1065_s19 = scalar_lea.hbm %s1143_s3, %s571_s30  ;;  %s1072_s5 = scalar_lea.hbm %s1142_s2, %s571_s30 }
  0x5d   : > { %s388_s9 = scalar_lea.sflag [#allocation13], %s1026_s23  ;;  %s728_s22 = scalar_lea.vmem %s1067_s18, 128 }
  0x5e   : > { %vm267_vm1 = vcmp.lt.s32.totalorder %v266_v4, 20  ;;  %p729_p8 = scmp.ne.s32.totalorder %s1067_s18, %s728_s22  ;;  %p1156_p13 = scmp.ne.s32.totalorder %s1148_s25, 0 }
  0x5f   : > { %v270_v7 = vsel %vm267_vm1, %v258_v5, -30.0  ;;  %v271_v8 = vsel %vm267_vm1, %v259_v6, -30.0  ;;  %v272_v24 = vsel %vm267_vm1, %v260_v19, 0.0  ;;  %v273_v26 = vsel %vm267_vm1, %v261_v21, 0.0  ;;  %s851_s11 = smov [#allocation12]  }
  0x60   : > { %v274_v9 = vand.u32 2147483647, %v270_v7  ;;  %v275_v10 = vand.u32 2147483647, %v271_v8  ;;  %vm284_vm2 = vcmp.ge.f32.partialorder %v270_v7, 0.0  ;;  %vm285_vm3 = vcmp.ge.f32.partialorder %v271_v8, 0.0  ;;  %p730_p6 = pnand %p729_p8, %p1156_p13 }
  0x61   : > { %v292_v30 = vmul.f32 %v272_v24, %v270_v7  ;;  %v290_v31 = vmax.f32 %v270_v7, 0.0  ;;  %v293_v32 = vmul.f32 %v273_v26, %v271_v8  ;;  %v325_v33 = vadd.f32 %v273_v26, %v272_v24  ;;  %v318_v45 = vld [vmem:[#allocation3] sm:$0xff]  ;;  %v330_v47 = vld [vmem:[#allocation5] sm:$0xff]  ;;  %v324_v49 = vld [vmem:[#allocation4] sm:$0xff]  ;;  %s732_s24 = sshll.u32 %s851_s11, 4  ;;  %s733_s24 = int_to_ptr.vmem [resolvable:$false] %s732_s24 }
  0x62   : > { %v276_v11 = vmul.f32 0.5, %v274_v9  ;;  %v277_v12 = vmul.f32 0.5, %v275_v10  ;;  %v291_v35 = vmax.f32 %v271_v8, 0.0  ;;  %v311_v54 = vld [vmem:[#allocation2] sm:$0xff]  ;;  %p731_p4 = pneg %p730_p6  ;;  %s734_s28 = scalar_lea.vmem %s733_s24, 256 }
  0x63   : > { %v294_v36 = vsub.f32 %v290_v31, %v292_v30  ;;  %p735_p7 = scmp.lt.s32.totalorder %s1067_s18, %s733_s24  ;;  %p736_p10 = scmp.lt.s32.totalorder %s734_s28, %s728_s22 }
  0x64   : > { %654 = vtanh.f32 %v276_v11  ;;  %v295_v38 = vsub.f32 %v291_v35, %v293_v32 }
  0x65   : > { %656 = vtanh.f32 %v277_v12  ;;  %p737_p0 = por %p736_p10, %p735_p7 }
  0x67   : > { %p738_p1 = pnand %p737_p0, %p731_p4 }
  0x6e   : > { %v655_v13 = vpop.eup %654 }
  0x6f   : > { %v657_v14 = vpop.eup %656  ;;  %v280_v15 = vadd.f32 1.0, %v655_v13 }
  0x70   : > { %v281_v16 = vadd.f32 1.0, %v657_v14 }
  0x71   : > { %v282_v17 = vmul.f32 0.5, %v280_v15 }
  0x72   : > { %v283_v18 = vmul.f32 0.5, %v281_v16 }
  0x73   : > { %v286_v20 = vsub.f32 1.0, %v282_v17  ;;  %658 = vlog2.f32 %v282_v17 }
  0x74   : > { %v287_v22 = vsub.f32 1.0, %v283_v18  ;;  %660 = vlog2.f32 %v283_v18 }
  0x75   : > { %v288_v23 = vsel %vm284_vm2, %v282_v17, %v286_v20 }
  0x76   : > { %v289_v25 = vsel %vm285_vm3, %v283_v18, %v287_v22  ;;  %v331_v27 = vmul.f32 %v288_v23, %v272_v24 }
  0x77   : > { %v319_v28 = vadd.f32 %v289_v25, %v288_v23  ;;  %v332_v29 = vmul.f32 %v289_v25, %v273_v26 }
  0x79   : > { %320 = vadd.xlane.f32.xlu0 %v319_v28  ;;  %v333_v34 = vadd.f32 %v332_v29, %v331_v27 }
  0x7b   : > { %334 = vadd.xlane.f32.xlu1 %v333_v34 }
  0x7d   : > { %v659_v37 = vpop.eup %658  ;;  %326 = vadd.xlane.f32.xlu0 %v325_v33 }
  0x7e   : > { %v661_v39 = vpop.eup %660  ;;  %v297_v40 = vmul.f32 0.6931472, %v659_v37 }
  0x7f   : > { %v299_v41 = vmul.f32 0.6931472, %v661_v39 }
  0x80   : > { %v300_v42 = vsub.f32 %v294_v36, %v297_v40 }
  0x81   : > { %v301_v43 = vsub.f32 %v295_v38, %v299_v41 }
  0x83   : > { %v312_v44 = vadd.f32 %v301_v43, %v300_v42 }
  0x85   : > { %313 = vadd.xlane.f32.xlu1 %v312_v44 }
 0x106   : > { %v321_v46 = vpop.xlane.xlu0 %320 }
 0x107   : > { %v322_v48 = vadd.f32 %v321_v46, %v318_v45 }
 0x108   : > { %v335_v50 = vpop.xlane.xlu1 %334 }
 0x109   : > { %323 = vst.msk [vmem:[#allocation3] sm:$0xff] %vm306_vm0, %v322_v48  ;;  %v336_v51 = vadd.f32 %v335_v50, %v330_v47 }
 0x10a   : > { %v327_v52 = vpop.xlane.xlu0 %326 }
 0x10b   : > { %v328_v53 = vadd.f32 %v327_v52, %v324_v49  ;;  %337 = vst.msk [vmem:[#allocation5] sm:$0xff] %vm306_vm0, %v336_v51 }
 0x10d   : > { %329 = vst.msk [vmem:[#allocation4] sm:$0xff] %vm306_vm0, %v328_v53 }
 0x110   : > { %v341_v55 = vld [vmem:[#allocation3] sm:$0xff] }
 0x111   : > { %v342_v56 = vadd.f32 1e-06, %v341_v55 }
 0x112   : > { %v314_v57 = vpop.xlane.xlu1 %313  ;;  %v345_v61 = vld [vmem:[#allocation5] sm:$0xff] }
 0x113   : > { %v315_v58 = vadd.f32 %v314_v57, %v311_v54  ;;  %662 = vrcp.f32 %v342_v56 }
 0x114   : > { %v343_v59 = vld [vmem:[#allocation4] sm:$0xff] }
 0x115   : > { %317 = vst.msk [vmem:[#allocation2] sm:$0xff] %vm306_vm0, %v315_v58  ;;  %v344_v60 = vadd.f32 1e-06, %v343_v59 }
 0x117   : > { %664 = vrcp.f32 %v344_v60 }
 0x11c   : > { %v367_v62 = vld [vmem:[#allocation2] sm:$0xff] }
 0x11d   : > { %v663_v63 = vpop.eup %662  ;;  %v368_v0 = vsel %vm306_vm0, %v367_v62, 0.0 }
 0x11e   : > { %369 = vadd.xlane.f32.xlu1 %v368_v0  ;;  %v347_v1 = vmul.f32 %v663_v63, %v345_v61 }
 0x120   : > { %v352_v4 = vmul.f32 4.0, %v347_v1  ;;  %v350_v7 = vmul.f32 5.0, %v347_v1 }
 0x121   : > { %v665_v2 = vpop.eup %664 }
 0x122   : > { %v349_v3 = vmul.f32 %v665_v2, %v345_v61 }
 0x124   : > { %v353_v5 = vadd.f32 %v352_v4, %v349_v3  ;;  %v351_v8 = vmul.f32 %v350_v7, %v349_v3 }
 0x126   : > { %v354_v6 = vadd.f32 1e-06, %v353_v5 }
 0x128   : > { %666 = vrcp.f32 %v354_v6 }
 0x132   : > { %v667_v9 = vpop.eup %666 }
 0x133   : > { %v356_v10 = vmul.f32 %v667_v9, %v351_v8 }
 0x135   : > { %v357_v11 = vsel %vm306_vm0, %v356_v10, 0.0 }
 0x136   : > { %358 = vadd.xlane.f32.xlu0 %v357_v11 }
 0x1ab   : > { %v370_v12 = vpop.xlane.xlu1 %369 }
 0x1ac   : > { %v371_v13 = vrot.slane %v370_v12, 4 }
 0x1ae   : > { %v372_v14 = vadd.f32 %v371_v13, %v370_v12 }
 0x1b0   : > { %v373_v15 = vrot.slane %v372_v14, 2 }
 0x1b2   : > { %v374_v19 = vadd.f32 %v373_v15, %v372_v14 }
 0x1b4   : > { %v375_v22 = vrot.slane %v374_v19, 1 }
 0x1b6   : > { %v376_v25 = vadd.f32 %v375_v22, %v374_v19 }
 0x1c3   : > { %v359_v16 = vpop.xlane.xlu0 %358 }
 0x1c4   : > { %v360_v17 = vrot.slane %v359_v16, 4 }
 0x1c6   : > { %v361_v18 = vadd.f32 %v360_v17, %v359_v16 }
 0x1c8   : > { %v362_v20 = vrot.slane %v361_v18, 2 }
 0x1ca   : > { %v363_v21 = vadd.f32 %v362_v20, %v361_v18 }
 0x1cc   : > { %v364_v23 = vrot.slane %v363_v21, 1 }
 0x1ce   : > { %v365_v24 = vadd.f32 %v364_v23, %v363_v21 }
 0x1d0   : > { %577 = vpush %v365_v24 }
 0x1d1   : > { %579 = vpush %v376_v25 }
 0x201   : > { %s578_s21 = spop %577 }
 0x202   : > { %v380_v26 = vstv %s578_s21  ;;  %s580_s8 = spop %579 }
 0x203   : > { %381 = vst [vmem:[%s255_s7] sm:$0xff] %v380_v26  ;;  %v378_v27 = vstv %s580_s8 }
 0x204   : > { %379 = vst [vmem:[%s248_s4] sm:$0xff] %v378_v27 }
 0x205   : > { %741 = shalt.err (!%p738_p1)
}
 0x206   : > { %s742_s4 = scalar_lea.hbm %s1065_s19, 128  ;;  %s746_s29 = scalar_lea.hbm %s1143_s3, 384 }
 0x207   : > { %p743_p9 = scmp.ne.s32.totalorder %s1065_s19, %s742_s4  ;;  %p747_p5 = scmp.lt.u32.totalorder %s1065_s19, %s1143_s3 }
 0x208   : > { %p748_p12 = scmp.lt.u32.totalorder %s746_s29, %s742_s4  ;;  %p750_p8 = scmp.lt.u32.totalorder %s742_s4, %s1065_s19 }
 0x209   : > { %p744_p11 = pnand %p743_p9, %p1156_p13 }
 0x20a   : > { %p749_p3 = por %p748_p12, %p747_p5 }
 0x20b   : > { %p745_p2 = pneg %p744_p11 }
 0x20c   : > { %p751_p6 = por %p750_p8, %p749_p3 }
 0x20e   : > { %p752_p4 = pnand %p751_p6, %p745_p2 }
 0x210   : > { %755 = shalt.err (!%p752_p4)
}
 0x211   : > { %586 = dma.vmem_to_hbm [thread:$0]  (%p1156_p13), %s1067_s18, 128, %s1065_s19, %s388_s9  }
 0x212   : > { %s383_s10 = scalar_lea.sflag [#allocation8], %s1026_s23  ;;  %s756_s15 = scalar_lea.vmem %s1060_s6, 128 }
 0x213   : > { %p757_p7 = scmp.ne.s32.totalorder %s1060_s6, %s756_s15  ;;  %s852_s22 = smov [#allocation11]  }
 0x214   : > { %s760_s11 = sshll.u32 %s852_s22, 4  ;;  %s761_s11 = int_to_ptr.vmem [resolvable:$false] %s760_s11 }
 0x215   : > { %p758_p10 = pnand %p757_p7, %p1156_p13  ;;  %s762_s24 = scalar_lea.vmem %s761_s11, 256 }
 0x216   : > { %p763_p1 = scmp.lt.s32.totalorder %s1060_s6, %s761_s11  ;;  %p764_p9 = scmp.lt.s32.totalorder %s762_s24, %s756_s15 }
 0x217   : > { %p759_p0 = pneg %p758_p10 }
 0x218   : > { %p765_p11 = por %p764_p9, %p763_p1 }
 0x21a   : > { %p766_p2 = pnand %p765_p11, %p759_p0 }
 0x21c   : > { %769 = shalt.err (!%p766_p2)
}
 0x21d   : > { %s770_s23 = scalar_lea.hbm %s1072_s5, 128  ;;  %s774_s9 = scalar_lea.hbm %s1142_s2, 384 }
 0x21e   : > { %p771_p5 = scmp.ne.s32.totalorder %s1072_s5, %s770_s23  ;;  %p775_p8 = scmp.lt.u32.totalorder %s1072_s5, %s1142_s2 }
 0x21f   : > { %p776_p6 = scmp.lt.u32.totalorder %s774_s9, %s770_s23  ;;  %p778_p7 = scmp.lt.u32.totalorder %s770_s23, %s1072_s5 }
 0x220   : > { %p772_p12 = pnand %p771_p5, %p1156_p13 }
 0x221   : > { %p777_p4 = por %p776_p6, %p775_p8 }
 0x222   : > { %p773_p3 = pneg %p772_p12 }
 0x223   : > { %p779_p10 = por %p778_p7, %p777_p4 }
 0x225   : > { %p780_p0 = pnand %p779_p10, %p773_p3 }
 0x227   : > { %783 = shalt.err (!%p780_p0)
}
 0x228   : > { %585 = dma.vmem_to_hbm [thread:$0]  (%p1156_p13), %s1060_s6, 128, %s1072_s5, %s383_s10  }
 0x229 PF: > { %p604_p1 = scmp.ge.s32.totalorder %s846_s17, 2  ;;  %s426_s30 = sand.u32 1, %s826_s12  }
 0x22a   : > { %p1157_p9 = scmp.ne.s32.totalorder %s1149_s27, 0  ;;  %s427_s7 = scalar_lea.sflag [#allocation8], %s426_s30 }
 0x22c   : > { %p597_p11 = pnand %p604_p1, %p1157_p9 }
 0x22e   : > { %817 = dma.done.wait (!%p597_p11), %s427_s7, 128  }
 0x22f   : > { %819 = vsyncadd (!%p597_p11), %s427_s7, 4294967168  ;;  %s436_s29 = scalar_lea.sflag [#allocation13], %s426_s30 }
 0x230   : > { %821 = dma.done.wait (!%p597_p11), %s436_s29, 128  }
 0x231   : > { %823 = vsyncadd (!%p597_p11), %s436_s29, 4294967168  ;;  %s26_s17 = sadd.s32 1, %s846_s17   ;;  %s1158_s12 = smov %s830_s13 }
 0x232   : > { %p23_p2 = scmp.ge.s32.totalorder %s26_s17, 5   ;;  %s1159_s13 = smov %s834_s14 }
 0x233   : > { %s1160_s14 = smov %s929_s26  ;;  %s1161_s15 = smov %s842_s16 }
 0x234   : > { %s1162_s16 = smov %s1164_s20  ;;  %25 = sbr.rel (!%p23_p2) target bundleno = 10 (0xa), region = 111 }
 0x23b   :  { %441 = vsyncpa [#allocation7], 1 }
 0x23c   :  { %443 = vsyncpa [#allocation7 + $0x1], 1 }
 0x23d   :  { %444 = vsyncpa [#allocation10], 1 }
 0x23e   :  { %446 = vsyncpa [#allocation10 + $0x1], 1 }
 0x23f   :  { %447 = vsyncpa [#allocation8], 1 }
 0x240   :  { %449 = vsyncpa [#allocation8 + $0x1], 1 }
 0x241   :  { %450 = vsyncpa [#allocation13], 1 }
 0x242   :  { %452 = vsyncpa [#allocation13 + $0x1], 1 }

</bundles_post_ra>
